<compile_context>
chip_gen: v6e
topology: v6e:2x2x1
jax: 0.10.0
libtpu: 0.0.40
codegen_flags: <defaults>
</compile_context>

<pallas_src>
import functools

import jax
import jax.numpy as jnp
from jax.experimental import pallas as pl
from jax.experimental.pallas import tpu as pltpu


_SUBLANE_PACK = {4: 8, 2: 16, 1: 32}  # f32 -> 8 rows, bf16 -> 16, int8 -> 32


def _cdiv(a, b):
    return -(-a // b)


def _round_up(a, b):
    return _cdiv(a, b) * b


# --------------------------------------------------------------------------
# Kernels
# --------------------------------------------------------------------------
def _adain_fused_kernel(x_ref, wb_ref, o_ref, *, eps, bf16_fast):
    """Single pass: full HW extent per block.  x_ref:(TBC,HW), wb_ref:(TBC,2)."""
    x = x_ref[...]
    xf = x.astype(jnp.float32)
    hw = x.shape[-1]
    inv_n = jnp.float32(1.0 / hw)

    mean = jnp.sum(xf, axis=-1, keepdims=True) * inv_n
    d = xf - mean
    # Mean-subtracted sum of squares: no E[x^2]-E[x]^2 cancellation.
    var = jnp.sum(d * d, axis=-1, keepdims=True) * inv_n

    w = wb_ref[:, 0:1]
    b = wb_ref[:, 1:2]
    scale = jax.lax.rsqrt(var + eps) * w

    if bf16_fast and x.dtype == jnp.bfloat16:
        # v6e/v7x: keep the big elementwise pass in bf16 (native bf16 VPU).
        shift = b - mean * scale
        y = x * scale.astype(x.dtype) + shift.astype(x.dtype)
    else:
        y = d * scale + b
    o_ref[...] = y.astype(o_ref.dtype)


def _adain_stats_kernel(x_ref, wb_ref, ss_ref, sum_sc, sq_sc, pilot_sc,
                        *, eps, hw_total, block_hw, needs_mask):
    """Two-pass (pass 1): accumulate per-row shifted sum / sumsq over HW tiles,
    finalize into (scale, shift) at the last HW tile.  ss_ref:(TBC,2) f32."""
    k = pl.program_id(1)
    xf = x_ref[...].astype(jnp.float32)

    if needs_mask:
        col = jax.lax.broadcasted_iota(jnp.int32, xf.shape, 1) + k * block_hw
        valid = col < hw_total
    else:
        valid = None

    @pl.when(k == 0)
    def _():
        # Pilot shift = mean of the first HW tile -> well-conditioned
        # (shifted) sum-of-squares instead of raw E[x^2] - E[x]^2.
        if valid is not None:
            n0 = jnp.sum(valid.astype(jnp.float32), axis=-1, keepdims=True)
            s0 = jnp.sum(jnp.where(valid, xf, 0.0), axis=-1, keepdims=True)
            pilot_sc[...] = s0 / jnp.maximum(n0, 1.0)
        else:
            pilot_sc[...] = jnp.mean(xf, axis=-1, keepdims=True)
        sum_sc[...] = jnp.zeros_like(sum_sc)
        sq_sc[...] = jnp.zeros_like(sq_sc)

    d = xf - pilot_sc[...]
    if valid is not None:
        d = jnp.where(valid, d, 0.0)
    sum_sc[...] += jnp.sum(d, axis=-1, keepdims=True)
    sq_sc[...] += jnp.sum(d * d, axis=-1, keepdims=True)

    @pl.when(k == pl.num_programs(1) - 1)
    def _():
        inv_n = jnp.float32(1.0 / hw_total)
        dm = sum_sc[...] * inv_n
        mean = pilot_sc[...] + dm
        var = jnp.maximum(sq_sc[...] * inv_n - dm * dm, 0.0)  # biased variance
        w = wb_ref[:, 0:1]
        b = wb_ref[:, 1:2]
        scale = jax.lax.rsqrt(var + eps) * w
        shift = b - mean * scale
        ss_ref[...] = jnp.concatenate([scale, shift], axis=-1)


def _adain_apply_kernel(x_ref, ss_ref, o_ref, *, bf16_fast):
    """Two-pass (pass 2): y = x * scale + shift, lane-dense stores.  Any
    out-of-bounds lanes of the last HW tile are dropped by Pallas on store."""
    scale = ss_ref[:, 0:1]
    shift = ss_ref[:, 1:2]
    x = x_ref[...]
    if bf16_fast and x.dtype == jnp.bfloat16:
        y = x * scale.astype(x.dtype) + shift.astype(x.dtype)
    else:
        y = x.astype(jnp.float32) * scale + shift
    o_ref[...] = y.astype(o_ref.dtype)


# --------------------------------------------------------------------------
# Hardware / block-size helpers
# --------------------------------------------------------------------------
def _vmem_capacity_bytes():
    try:
        return int(pltpu.get_tpu_info().vmem_capacity_bytes)
    except Exception:
        return 64 * 1024 * 1024  # conservative (v7x per-TC)


def _is_v5e():
    try:
        kind = jax.devices()[0].device_kind.lower()
    except Exception:
        return False
    return ("v5 lite" in kind) or ("v5e" in kind) or ("v5litepod" in kind)


def _largest_divisor_multiple(n, m, cap):
    """Largest d <= cap with n % d == 0 and d % m == 0, else None."""
    d = (min(cap, n) // m) * m
    while d >= m:
        if n % d == 0:
            return d
        d -= m
    return None


def _pick_block_rows(bc, hw, itemsize, sub, target_bytes, min_grid=2):
    """Rows per block: ~target_bytes, multiple of `sub`, divides bc, and keeps
    at least `min_grid` blocks along BC when possible (v7x megacore)."""
    row_bytes = max(1, hw * itemsize)
    want = max(sub, (target_bytes // row_bytes) // sub * sub)
    if bc >= min_grid * sub:
        want = min(want, max(sub, (bc // min_grid) // sub * sub))
    if want >= bc:
        return bc
    d = _largest_divisor_multiple(bc, sub, want)
    return d if d is not None else bc


def _check_block_rows(block_bc, bc, sub):
    if block_bc == bc:
        return
    if bc % block_bc != 0 or block_bc % sub != 0:
        raise ValueError(
            f"block_bc={block_bc} must divide BC={bc} and be a multiple of the "
            f"sublane pack ({sub}) unless it equals BC")


# --------------------------------------------------------------------------
# Public wrapper
# --------------------------------------------------------------------------
def adaptive_instance_norm_2d(
    x, weight, bias, *,
    eps=1e-5,
    block_bc=None,
    block_hw=None,
    force_two_pass=False,
    target_block_bytes=None,
    max_single_pass_block_bytes=None,
    vmem_limit_bytes=None,
    bf16_fast=None,
):
    """AdaIN forward.

    x:      (B, C, H, W)
    weight: (B*C,) per-instance-channel scale (assigned externally in AdaIN)
    bias:   (B*C,) per-instance-channel shift
    """
    B, C, H, W = x.shape
    BC, HW = B * C, H * W
    itemsize = jnp.dtype(x.dtype).itemsize
    sub = _SUBLANE_PACK.get(itemsize, 8)

    # ---- generation-aware budgets ----
    vmem_cap = _vmem_capacity_bytes()
    if vmem_limit_bytes is None:
        vmem_limit_bytes = max(32 * 2**20,
                               min(vmem_cap * 5 // 8, vmem_cap - 16 * 2**20))
    headroom = 4 * 2**20
    if max_single_pass_block_bytes is None:
        max_single_pass_block_bytes = max(2 * 2**20,
                                          (vmem_limit_bytes - headroom) // 4)
    if target_block_bytes is None:
        target_block_bytes = min(8 * 2**20, max_single_pass_block_bytes)
    if bf16_fast is None:
        bf16_fast = not _is_v5e()   # v5e has no native bf16 VPU -> compute in f32

    x2d = x.reshape(BC, HW)
    # Fuse weight & bias into one (BC, 2) f32 array -> single small DMA per step.
    wb = jnp.stack(
        [jnp.asarray(weight, jnp.float32).reshape(BC),
         jnp.asarray(bias, jnp.float32).reshape(BC)],
        axis=-1,
    )

    if block_bc is None:
        fused_block_bc = _pick_block_rows(BC, HW, itemsize, sub, target_block_bytes)
    else:
        fused_block_bc = block_bc
    _check_block_rows(fused_block_bc, BC, sub)

    two_pass = force_two_pass or (
        fused_block_bc * HW * itemsize > max_single_pass_block_bytes)

    # ---------------- Fused single-pass path (2x HBM traffic) ----------------
    if not two_pass:
        bbc = fused_block_bc
        grid = (BC // bbc,)
        kernel = functools.partial(_adain_fused_kernel, eps=eps, bf16_fast=bf16_fast)
        out2d = pl.pallas_call(
            kernel,
            out_shape=jax.ShapeDtypeStruct((BC, HW), x.dtype),
            grid_spec=pltpu.PrefetchScalarGridSpec(
                num_scalar_prefetch=0,
                grid=grid,
                in_specs=[
                    pl.BlockSpec((bbc, HW), lambda i: (i, 0)),
                    pl.BlockSpec((bbc, 2), lambda i: (i, 0)),
                ],
                out_specs=pl.BlockSpec((bbc, HW), lambda i: (i, 0)),
            ),
            compiler_params=pltpu.CompilerParams(
                dimension_semantics=("parallel",),
                vmem_limit_bytes=int(vmem_limit_bytes)),
        )(x2d, wb)
        return out2d.reshape(B, C, H, W)

    # ---------------- Two-pass path: tile HW as well (3x HBM traffic) --------
    if block_bc is None:
        # Minimal rows -> maximal columns: longest contiguous HBM strips per DMA.
        block_bc = sub if (BC >= sub and BC % sub == 0) else BC
    _check_block_rows(block_bc, BC, sub)

    if block_hw is None:
        max_cols = max(128, (target_block_bytes // max(1, block_bc * itemsize))
                       // 128 * 128)
        if HW <= max_cols:
            block_hw = HW                      # full extent, no masking needed
        else:
            nhw_t = _cdiv(HW, max_cols)
            block_hw = _round_up(_cdiv(HW, nhw_t), 128)   # 128-lane aligned
    elif block_hw != HW and block_hw % 128 != 0:
        raise ValueError(f"block_hw={block_hw} must be a multiple of 128 or equal H*W={HW}")

    needs_mask = (HW % block_hw) != 0
    nbc = BC // block_bc
    nhw = _cdiv(HW, block_hw)

    stats_kernel = functools.partial(
        _adain_stats_kernel, eps=eps, hw_total=HW,
        block_hw=block_hw, needs_mask=needs_mask)
    scale_shift = pl.pallas_call(
        stats_kernel,
        out_shape=jax.ShapeDtypeStruct((BC, 2), jnp.float32),
        grid_spec=pltpu.PrefetchScalarGridSpec(
            num_scalar_prefetch=0,
            grid=(nbc, nhw),
            in_specs=[
                pl.BlockSpec((block_bc, block_hw), lambda i, k: (i, k)),
                pl.BlockSpec((block_bc, 2), lambda i, k: (i, 0)),
            ],
            out_specs=pl.BlockSpec((block_bc, 2), lambda i, k: (i, 0)),
            scratch_shapes=[
                pltpu.VMEM((block_bc, 1), jnp.float32),
                pltpu.VMEM((block_bc, 1), jnp.float32),
                pltpu.VMEM((block_bc, 1), jnp.float32),
            ],
        ),
        compiler_params=pltpu.CompilerParams(
            dimension_semantics=("parallel", "arbitrary"),
            vmem_limit_bytes=int(vmem_limit_bytes)),
    )(x2d, wb)

    apply_kernel = functools.partial(_adain_apply_kernel, bf16_fast=bf16_fast)
    out2d = pl.pallas_call(
        apply_kernel,
        out_shape=jax.ShapeDtypeStruct((BC, HW), x.dtype),
        grid_spec=pltpu.PrefetchScalarGridSpec(
            num_scalar_prefetch=0,
            grid=(nbc, nhw),
            in_specs=[
                pl.BlockSpec((block_bc, block_hw), lambda i, k: (i, k)),
                pl.BlockSpec((block_bc, 2), lambda i, k: (i, 0)),
            ],
            out_specs=pl.BlockSpec((block_bc, block_hw), lambda i, k: (i, k)),
        ),
        compiler_params=pltpu.CompilerParams(
            dimension_semantics=("parallel", "parallel"),
            vmem_limit_bytes=int(vmem_limit_bytes)),
    )(x2d, scale_shift)
    return out2d.reshape(B, C, H, W)


# --------------------------------------------------------------------------
# Pure-JAX reference (mirrors F.batch_norm(training=True) on (1, B*C, H, W))
# --------------------------------------------------------------------------
def _reference_adain(x, weight, bias, eps=1e-5):
    B, C, H, W = x.shape
    xr = x.reshape(B * C, H * W).astype(jnp.float32)
    mean = xr.mean(axis=-1, keepdims=True)
    var = ((xr - mean) ** 2).mean(axis=-1, keepdims=True)
    y = (xr - mean) / jnp.sqrt(var + eps)
    y = y * weight.reshape(-1, 1) + bias.reshape(-1, 1)
    return y.reshape(B, C, H, W).astype(x.dtype)


if __name__ == "__main__":
    B, C, H, W = 2, 4, 16, 16
    num_features = C

    key = jax.random.PRNGKey(0)
    kx, kw, kb = jax.random.split(key, 3)

    x = jax.random.normal(kx, (B, C, H, W), dtype=jnp.float32)
    # AdaIN weight/bias are assigned externally (e.g. from an MLP), shape (B*C,).
    weight = 1.0 + 0.1 * jax.random.normal(kw, (B * num_features,), dtype=jnp.float32)
    bias = 0.1 * jax.random.normal(kb, (B * num_features,), dtype=jnp.float32)

    ref = _reference_adain(x, weight, bias, eps=1e-5)

    # 1) Fast fused single-pass path.
    out = adaptive_instance_norm_2d(x, weight, bias, eps=1e-5)
    out = jax.block_until_ready(out)
    assert out.shape == (B, C, H, W)
    assert jnp.allclose(out, ref, atol=1e-4, rtol=1e-4), "single-pass mismatch vs reference"

    # 2) HW-tiled two-pass path (used automatically for very large H*W), exact
    #    tiling (HW % block_hw == 0).
    out2 = adaptive_instance_norm_2d(
        x, weight, bias, eps=1e-5, force_two_pass=True, block_hw=128)
    out2 = jax.block_until_ready(out2)
    assert jnp.allclose(out2, ref, atol=1e-4, rtol=1e-4), "two-pass mismatch vs reference"

    # 3) Two-pass path with non-128-divisible HW (in-kernel column masking +
    #    dropped out-of-bounds stores on the boundary tile).
    H3 = W3 = 20
    x3 = jax.random.normal(jax.random.PRNGKey(1), (B, C, H3, W3), dtype=jnp.float32)
    ref3 = _reference_adain(x3, weight, bias, eps=1e-5)
    out3 = adaptive_instance_norm_2d(
        x3, weight, bias, eps=1e-5, force_two_pass=True, block_hw=128)
    out3 = jax.block_until_ready(out3)
    assert jnp.allclose(out3, ref3, atol=1e-4, rtol=1e-4), "masked two-pass mismatch vs reference"

    # 4) bf16 input coverage (fast bf16 apply path on v6e/v7x, f32 on v5e).
    xb = x.astype(jnp.bfloat16)
    outb = adaptive_instance_norm_2d(xb, weight, bias, eps=1e-5)
    outb = jax.block_until_ready(outb)
    assert outb.shape == (B, C, H, W) and bool(jnp.all(jnp.isfinite(outb.astype(jnp.float32))))

    # TODO(synk): running_mean / running_var momentum updates (training-only
    # buffer side effect in PyTorch) are not materialized; forward output is
    # unaffected by them.

    print("KERNEL_OK")
</pallas_src>

<mosaic_0001>
module attributes {stable_mosaic.version = 11 : i64} {
  func.func @_adain_fused_kernel(%arg0: i32, %arg1: memref<8x256xf32, #tpu.memory_space<vmem>>, %arg2: memref<8x2xf32, #tpu.memory_space<vmem>>, %arg3: memref<8x256xf32, #tpu.memory_space<vmem>>) attributes {dimension_semantics = [#tpu.dimension_semantics<parallel>], iteration_bounds = array<i64: 1>, scalar_prefetch = 0 : i64, scratch_operands = 0 : i64, tpu.core_type = #tpu.core_type<tc>, window_params = [{transform_indices = @transform_0, window_bounds = array<i64: 8, 256>}, {transform_indices = @transform_1, window_bounds = array<i64: 8, 2>}, {transform_indices = @transform_2, window_bounds = array<i64: 8, 256>}]} {
    %c0 = arith.constant 0 : index
    %c0_0 = arith.constant 0 : index
    %0 = vector.load %arg1[%c0, %c0_0] : memref<8x256xf32, #tpu.memory_space<vmem>>, vector<8x256xf32>
    %cst = arith.constant dense<0.000000e+00> : vector<8xf32>
    %1 = vector.multi_reduction <add>, %0, %cst [1] : vector<8x256xf32> to vector<8xf32>
    %2 = vector.shape_cast %1 : vector<8xf32> to vector<8x1xf32>
    %cst_1 = arith.constant 3.906250e-03 : f32
    %3 = vector.broadcast %cst_1 : f32 to vector<8x1xf32>
    %4 = arith.mulf %2, %3 : vector<8x1xf32>
    %5 = vector.broadcast %4 : vector<8x1xf32> to vector<8x256xf32>
    %6 = arith.subf %0, %5 : vector<8x256xf32>
    %7 = arith.mulf %6, %6 : vector<8x256xf32>
    %cst_2 = arith.constant dense<0.000000e+00> : vector<8xf32>
    %8 = vector.multi_reduction <add>, %7, %cst_2 [1] : vector<8x256xf32> to vector<8xf32>
    %9 = vector.shape_cast %8 : vector<8xf32> to vector<8x1xf32>
    %cst_3 = arith.constant 3.906250e-03 : f32
    %10 = vector.broadcast %cst_3 : f32 to vector<8x1xf32>
    %11 = arith.mulf %9, %10 : vector<8x1xf32>
    %c0_4 = arith.constant 0 : index
    %c0_5 = arith.constant 0 : index
    %12 = vector.load %arg2[%c0_4, %c0_5] : memref<8x2xf32, #tpu.memory_space<vmem>>, vector<8x1xf32>
    %c0_6 = arith.constant 0 : index
    %c1 = arith.constant 1 : index
    %13 = vector.load %arg2[%c0_6, %c1] : memref<8x2xf32, #tpu.memory_space<vmem>>, vector<8x1xf32>
    %cst_7 = arith.constant 9.99999974E-6 : f32
    %14 = vector.broadcast %cst_7 : f32 to vector<8x1xf32>
    %15 = arith.addf %11, %14 : vector<8x1xf32>
    %16 = math.rsqrt %15 : vector<8x1xf32>
    %17 = arith.mulf %16, %12 : vector<8x1xf32>
    %18 = vector.broadcast %17 : vector<8x1xf32> to vector<8x256xf32>
    %19 = arith.mulf %6, %18 : vector<8x256xf32>
    %20 = vector.broadcast %13 : vector<8x1xf32> to vector<8x256xf32>
    %21 = arith.addf %19, %20 : vector<8x256xf32>
    %c0_8 = arith.constant 0 : index
    %c0_9 = arith.constant 0 : index
    %22 = vector.load %arg3[%c0_8, %c0_9] : memref<8x256xf32, #tpu.memory_space<vmem>>, vector<8x256xf32>
    tpu.vector_store %arg3[%c0_8, %c0_9], %21 {strides = array<i32>} : memref<8x256xf32, #tpu.memory_space<vmem>>, vector<8x256xf32>,
    return
  }
  func.func @transform_0(%arg0: i32) -> (i32, i32) {
    %c0_i32 = arith.constant 0 : i32
    %c0_i32_0 = arith.constant 0 : i32
    return %arg0, %c0_i32 : i32, i32
  }
  func.func @transform_1(%arg0: i32) -> (i32, i32) {
    %c0_i32 = arith.constant 0 : i32
    %c0_i32_0 = arith.constant 0 : i32
    return %arg0, %c0_i32 : i32, i32
  }
  func.func @transform_2(%arg0: i32) -> (i32, i32) {
    %c0_i32 = arith.constant 0 : i32
    %c0_i32_0 = arith.constant 0 : i32
    return %arg0, %c0_i32 : i32, i32
  }
}

</mosaic_0001>

<bundles_post_ra>
// kernel: tpu_custom_call.1
= control target key start
LH: loop header
LB: loop body
LE: loop exit
PB: predicated region body
PF: predicated region fallthrough
CT: control target
= control target key end

     0   :  { %7 = vsyncpa [#allocation3], 0  ;;  %s154_s0 = inlined_call_operand.hbm [shape: f32[8,256], index: 0, kind: input, shape index: {}]   ;;  %s155_s1 = inlined_call_operand.vmem [shape: f32[8,2], index: 1, kind: input, shape index: {}]   ;;  %s156_s2 = inlined_call_operand.hbm [shape: f32[8,256], index: 2, kind: output, shape index: {}]  }
   0x1   :  { %8 = vsyncpa [#allocation4], 0  ;;  %s126_s9 = smov [#allocation2]  }
   0x2   :  { %s15_s10 = sshll.u32 %s126_s9, 4  ;;  %s16_s10 = int_to_ptr.vmem [resolvable:$true] %s15_s10 }
   0x3   :  { %s90_s11 = scalar_lea.vmem %s16_s10, 256  ;;  %p95_p1 = scmp.lt.s32.totalorder %s16_s10, %s16_s10 }
   0x4   :  { %p91_p0 = scmp.ne.s32.totalorder %s16_s10, %s90_s11  ;;  %p96_p2 = scmp.lt.s32.totalorder %s90_s11, %s90_s11 }
   0x6   :  { %p97_p3 = por %p96_p2, %p95_p1 }
   0x8   :  { %p98_p4 = pnand %p97_p3, %p91_p0 }
   0xa   :  { %101 = shalt.err (!%p98_p4)
}
   0xb   :  { %18 = dma.hbm_to_vmem [thread:$0]  %s154_s0, 256, %s16_s10, [#allocation3]  }
   0xc   :  { %122 = dma.done.wait [#allocation3], 256  }
   0xd   :  { %123 = vsyncadd [#allocation3], 4294967040  ;;  %v24_v0 = vld [vmem:[#allocation2] sm:$0xff]  ;;  %v25_v1 = vld [vmem:[#allocation2 + $0x8] sm:$0xff]  ;;  %v127_v10 = vmov 0   ;;  %v128_v11 = vmov 1  }
   0xe   :  { %v26_v2 = vadd.f32 %v25_v1, %v24_v0  ;;  %77 = vset.pattern.permute.xlu1 %v127_v10  ;;  %79 = vset.pattern.permute.xlu0 %v128_v11  ;;  %v38_v15 = vld [vmem:[%s155_s1] sm:$0xff]  ;;  %s129_s15 = smov [#allocation5]  }
   0xf   :  { %s64_s16 = sshll.u32 %s129_s15, 4  ;;  %s65_s16 = int_to_ptr.vmem [resolvable:$true] %s64_s16 }
  0x10   :  { %27 = vadd.xlane.f32.xlu0 %v26_v2  ;;  %s102_s17 = scalar_lea.vmem %s65_s16, 256  ;;  %p107_p6 = scmp.lt.s32.totalorder %s65_s16, %s65_s16 }
  0x11   :  { %p103_p5 = scmp.ne.s32.totalorder %s65_s16, %s102_s17  ;;  %p108_p7 = scmp.lt.s32.totalorder %s102_s17, %s102_s17 }
  0x13   :  { %p109_p8 = por %p108_p7, %p107_p6 }
  0x15   :  { %p110_p9 = pnand %p109_p8, %p103_p5 }
  0x99   :  { %v28_v3 = vpop.xlane.xlu0 %27 }
  0x9a   :  { %v29_v4 = vmul.f32 0.00390625, %v28_v3 }
  0x9c   :  { %v30_v5 = vsub.f32 %v24_v0, %v29_v4  ;;  %v31_v6 = vsub.f32 %v25_v1, %v29_v4 }
  0x9e   :  { %v32_v7 = vmul.f32 %v30_v5, %v30_v5  ;;  %v33_v8 = vmul.f32 %v31_v6, %v31_v6 }
  0xa0   :  { %v34_v9 = vadd.f32 %v33_v8, %v32_v7 }
  0xa2   :  { %35 = vadd.xlane.f32.xlu0 %v34_v9 }
 0x12b   :  { %v36_v12 = vpop.xlane.xlu0 %35 }
 0x12c   :  { %v37_v13 = vmul.f32 0.00390625, %v36_v12 }
 0x12e   :  { %v39_v14 = vadd.f32 1e-05, %v37_v13 }
 0x130   :  { %80 = vrsqrt.f32 %v39_v14 }
 0x13d   :  { %v81_v16 = vpop.eup %80 }
 0x13e   :  { %v41_v17 = vmul.f32 %v81_v16, %v38_v15 }
 0x140   :  { %44 = vperm.xlu1 %77, %v41_v17  }
 0x144   :  { %78 = vset.pattern.permute.xlu1 %v128_v11 }
 0x145   :  { %51 = vperm.xlu1 %78, %v38_v15  }
 0x1bb   :  { %v45_v18 = vpop.permute.xlu1 %44 }
 0x1bc   :  { %v47_v19 = vmul.f32 %v45_v18, %v30_v5  ;;  %v48_v20 = vmul.f32 %v45_v18, %v31_v6 }
 0x1c0   :  { %v52_v21 = vpop.permute.xlu1 %51 }
 0x1c1   :  { %v54_v22 = vadd.f32 %v52_v21, %v47_v19  ;;  %v55_v23 = vadd.f32 %v52_v21, %v48_v20 }
 0x1c3   :  { %56 = vst [vmem:[#allocation5] sm:$0xff] %v54_v22  ;;  %57 = vst [vmem:[#allocation5 + $0x8] sm:$0xff] %v55_v23 }
 0x1c4   :  { %113 = shalt.err (!%p110_p9)
}
 0x1c5   :  { %67 = dma.vmem_to_hbm [thread:$0]  %s65_s16, 256, %s156_s2, [#allocation4]  }
 0x1c6   :  { %124 = dma.done.wait [#allocation4], 256  }
 0x1c7   :  { %125 = vsyncadd [#allocation4], 4294967040 }
 0x1c8   :  { %71 = vsyncpa [#allocation3], 1 }
 0x1c9   :  { %72 = vsyncpa [#allocation4], 1 }

</bundles_post_ra>
